<compile_context>
chip_gen: v7x
topology: tpu7x:2x2x1
jax: 0.10.0
libtpu: 0.0.40
codegen_flags: <defaults>
</compile_context>

<pallas_src>
import numpy as np
import jax
import jax.numpy as jnp
from jax.experimental import pallas as pl
from jax.experimental.pallas import tpu as pltpu


def _round_up(x, m):
    return ((x + m - 1) // m) * m


# ----------------------------- Pallas kernel ------------------------------ #
def gcn2_all_variants(w_grp, d, s_t_bf16, d_row, g1_bf16, b1, w2_bf16, b2):
    """All edge-mask variants, VG variants per grid step batched into the M axis.

    w_grp    : [NG, VG, E_pad] f32   per-variant edge weights (sigmoid applied)
    d        : [N_pad, E_pad]  f32   destination one-hot incidence (resident)
    s_t_bf16 : [E_pad, N_pad]  bf16  source one-hot incidence, transposed
    d_row    : [1, E_pad]      f32   D[node_idx, :]   (traced node_idx)
    g1_bf16  : [E_pad, H_pad]  bf16  S^T @ (X @ W1)   (hoisted, mask-free)
    returns  : [NG, VG, C_pad] f32   node_idx-row logits per variant
    """
    ng, vg, e_pad = w_grp.shape
    n_pad = d.shape[0]
    h_pad = g1_bf16.shape[1]
    c_pad = w2_bf16.shape[1]

    def kernel(w_ref, d_ref, st_ref, drow_ref, g1_ref, b1_ref, w2_ref, b2_ref, o_ref):
        w = w_ref[0]                                   # (VG, E_pad) f32
        dmat = d_ref[...]                              # (N_pad, E_pad) f32

        # ---- layer 1 for all VG variants, stacked along sublanes (M axis) ----
        # H_v = relu((D * w_v) @ G1 + b1)      (one big bf16 dot, f32 accumulate)
        lhs_parts = []
        for v in range(vg):
            lhs_parts.append((dmat * w[v:v + 1, :]).astype(jnp.bfloat16))
        lhs = jnp.concatenate(lhs_parts, axis=0)       # (VG*N_pad, E_pad) bf16
        h = jnp.dot(lhs, g1_ref[...], preferred_element_type=jnp.float32)
        h = jnp.maximum(h + b1_ref[...], 0.0).astype(jnp.bfloat16)   # (VG*N_pad, H_pad)

        # ---- layer 2: node_idx row only.  a_row_v = (D[node_idx]*w_v) @ S^T ----
        arow_lhs = (drow_ref[...] * w).astype(jnp.bfloat16)          # (VG, E_pad)
        a_rows = jnp.dot(arow_lhs, st_ref[...],
                         preferred_element_type=jnp.float32)         # (VG, N_pad) f32

        # spread a_rows block-diagonally so ONE dot contracts a_rows[v] with H_v
        cols = []
        for v in range(vg):
            sel = jax.lax.broadcasted_iota(jnp.int32, (vg, n_pad), 0) == v
            cols.append(jnp.where(sel, a_rows, 0.0))
        bd = jnp.concatenate(cols, axis=1).astype(jnp.bfloat16)      # (VG, VG*N_pad)

        hrow = jnp.dot(bd, h, preferred_element_type=jnp.float32)    # (VG, H_pad)
        out = jnp.dot(hrow.astype(jnp.bfloat16), w2_ref[...],
                      preferred_element_type=jnp.float32) + b2_ref[...]  # (VG, C_pad)
        o_ref[0] = out

    const = lambda shape: pl.BlockSpec(shape, lambda i: (0, 0))

    return pl.pallas_call(
        kernel,
        out_shape=jax.ShapeDtypeStruct((ng, vg, c_pad), jnp.float32),
        grid=(ng,),
        in_specs=[
            pl.BlockSpec((1, vg, e_pad), lambda i: (i, 0, 0)),  # per-step variant weights
            const((n_pad, e_pad)),                              # D          (resident)
            const((e_pad, n_pad)),                              # S^T  bf16  (resident)
            const((1, e_pad)),                                  # D[node_idx, :]
            const((e_pad, h_pad)),                              # G1 = S^T (X W1), bf16
            const((1, h_pad)),                                  # b1
            const((h_pad, c_pad)),                              # W2  bf16
            const((1, c_pad)),                                  # b2
        ],
        out_specs=pl.BlockSpec((1, vg, c_pad), lambda i: (i, 0, 0)),
        compiler_params=pltpu.CompilerParams(
            dimension_semantics=("parallel",)),   # 2 steps -> both TCs on v7x
    )(w_grp, d, s_t_bf16, d_row, g1_bf16, b1, w2_bf16, b2)


# ------------------------------- collector --------------------------------- #
class XCollector:
    """Minimal port of dig XCollector (fidelity / fidelity_inv only)."""

    def __init__(self, sparsity=None):
        self.related_preds = {'zero': [], 'masked': [], 'maskout': [],
                              'origin': [], 'sparsity': []}
        self.targets = []
        self.masks = []

    def collect_data(self, masks, related_preds, label=0):
        for key, value in related_preds[label].items():
            self.related_preds[key].append(value)
        for key in self.related_preds:
            if key not in related_preds[0]:
                self.related_preds[key].append(None)
        self.targets.append(label)
        self.masks.append(masks)

    @property
    def fidelity(self):
        ori = np.asarray(self.related_preds['origin'], np.float32)
        maskout = np.asarray(self.related_preds['maskout'], np.float32)
        return float(np.mean(ori - maskout))

    @property
    def fidelity_inv(self):
        ori = np.asarray(self.related_preds['origin'], np.float32)
        masked = np.asarray(self.related_preds['masked'], np.float32)
        return float(np.mean(ori - masked))


# --------------------------- explanation processor -------------------------- #
class ExplanationProcessor:
    """JAX/Pallas port of ExplanationProcessor.forward for the synthetic GCN."""

    def __init__(self, params, edge_index, num_nodes, num_classes):
        w1, b1, w2, b2 = params
        self.num_nodes = int(num_nodes)
        self.num_edges = int(edge_index.shape[1])
        self.num_classes = int(num_classes)

        # add self-loops -> edge-mask length = num_edges + num_nodes (PyG semantics)
        self_loops = jnp.stack([jnp.arange(num_nodes), jnp.arange(num_nodes)])
        edge_index_sl = jnp.concatenate([jnp.asarray(edge_index), self_loops], axis=1)
        self.e_total = int(edge_index_sl.shape[1])

        # lane-dense padded sizes (128-wide MXU operands, unmasked lane stores)
        self.n_pad = _round_up(self.num_nodes, 128)
        self.e_pad = _round_up(self.e_total, 128)
        self.h_pad = _round_up(int(w1.shape[1]), 128)
        self.c_pad = _round_up(int(w2.shape[1]), 128)

        # variants: origin, zero, C masked, C maskout; grouped 2 grid steps wide
        self.n_variants = 2 + 2 * self.num_classes
        self.ng = 2
        self.vg = -(-self.n_variants // self.ng)

        # one-hot incidence matrices, built ONCE (no per-variant scatter):
        # A_v = (D * w_v) @ S^T is never materialized; only its node_idx row is.
        src, dst = edge_index_sl[0], edge_index_sl[1]
        e_ids = jnp.arange(self.e_total)
        self.d_mat = jnp.zeros((self.n_pad, self.e_pad), jnp.float32).at[dst, e_ids].set(1.0)
        s_t = jnp.zeros((self.e_pad, self.n_pad), jnp.float32).at[e_ids, src].set(1.0)
        self.s_t_f32 = s_t                            # wrapper-side G1 precompute
        self.s_t_bf16 = s_t.astype(jnp.bfloat16)      # MXU operand (0/1 -> exact)

        def pad2(a, r, c):
            a = jnp.asarray(a, jnp.float32)
            return jnp.zeros((r, c), jnp.float32).at[:a.shape[0], :a.shape[1]].set(a)

        self.w1 = jnp.asarray(w1, jnp.float32)        # used for the hoisted X @ W1
        self.b1_p = pad2(b1, 1, self.h_pad)
        self.w2_bf16 = pad2(w2, self.h_pad, self.c_pad).astype(jnp.bfloat16)
        self.b2_p = pad2(b2, 1, self.c_pad)

        # node_idx is TRACED (no static_argnums) -> one compile for all nodes
        self._eval = jax.jit(self._eval_impl)

    # fused: variant-weight build + one Pallas call + softmax/gather
    def _eval_impl(self, x, masks, node_idx):
        c = self.num_classes

        # hoisted, mask-independent feature transforms (once per forward, f32)
        xw1 = jnp.dot(x.astype(jnp.float32), self.w1)                    # [N, HID]
        xw1_p = jnp.zeros((self.n_pad, self.h_pad), jnp.float32)
        xw1_p = xw1_p.at[:xw1.shape[0], :xw1.shape[1]].set(xw1)
        g1 = jnp.dot(self.s_t_f32, xw1_p).astype(jnp.bfloat16)           # S^T @ (X W1)

        # variant edge weights: sigmoid(+inf)=1, sigmoid(-inf)=0,
        # sigmoid(-m) = 1 - sigmoid(m) -> one f32 sigmoid per class mask.
        sig = jax.nn.sigmoid(masks.astype(jnp.float32))                  # [C, E_total]
        ones = jnp.ones((1, self.e_total), jnp.float32)
        zeros = jnp.zeros((1, self.e_total), jnp.float32)
        # layout: 0 = origin, 1 = zero, 2..2+C-1 = masked, 2+C.. = maskout
        w_all = jnp.concatenate([ones, zeros, sig, 1.0 - sig], axis=0)   # [V, E_total]
        w_pad = jnp.zeros((self.ng * self.vg, self.e_pad), jnp.float32)
        w_pad = w_pad.at[:w_all.shape[0], :self.e_total].set(w_all)
        w_grp = w_pad.reshape(self.ng, self.vg, self.e_pad)

        # node_idx row of the destination incidence (traced scalar -> no recompile)
        d_row = jax.lax.dynamic_slice_in_dim(self.d_mat, node_idx, 1, axis=0)  # [1,E_pad]

        out = gcn2_all_variants(w_grp, self.d_mat, self.s_t_bf16, d_row, g1,
                                self.b1_p, self.w2_bf16, self.b2_p)      # [NG,VG,C_pad]

        rows = out.reshape(self.ng * self.vg, self.c_pad)[:self.n_variants, :c]
        probs = jax.nn.softmax(rows, axis=-1)                            # real classes only
        labels = jnp.arange(c)
        origin_p = probs[0, labels]
        zero_p = probs[1, labels]
        masked_p = probs[2 + labels, labels]
        maskout_p = probs[2 + c + labels, labels]
        return jnp.stack([zero_p, masked_p, maskout_p, origin_p], axis=0)  # [4, C]

    def eval_related_pred(self, x, masks, node_idx=0):
        masks_arr = jnp.stack([jnp.asarray(m, jnp.float32) for m in masks], axis=0)
        # exactly ONE device -> host transfer for all variants/labels
        out = np.asarray(jax.device_get(
            self._eval(x, masks_arr, jnp.int32(node_idx))))
        related_preds = []
        for label in range(len(masks)):
            related_preds.append({
                'zero': float(out[0, label]),
                'masked': float(out[1, label]),
                'maskout': float(out[2, label]),
                'origin': float(out[3, label]),
            })
        return related_preds

    def forward(self, x, y, masks, x_collector, node_idx=None):
        y_idx = 0 if node_idx is None else node_idx
        label = int(y[y_idx])
        related_preds = self.eval_related_pred(
            x, masks, node_idx=0 if node_idx is None else node_idx)
        x_collector.collect_data(masks, related_preds, label)
        return related_preds


# --------------------------------- main ------------------------------------ #
if __name__ == "__main__":
    N, F_IN, HID, C, E = 8, 16, 32, 3, 12   # nodes, in-feat, hidden, classes, edges

    keys = jax.random.split(jax.random.PRNGKey(0), 10)
    x = jax.random.normal(keys[0], (N, F_IN), jnp.float32)
    edge_index = jax.random.randint(keys[1], (2, E), 0, N)
    y = jnp.zeros((N,), jnp.int32)

    # deterministic synthetic GNN parameters
    w1 = 0.1 * jax.random.normal(keys[2], (F_IN, HID), jnp.float32)
    b1 = 0.1 * jax.random.normal(keys[3], (1, HID), jnp.float32)
    w2 = 0.1 * jax.random.normal(keys[4], (HID, C), jnp.float32)
    b2 = 0.1 * jax.random.normal(keys[5], (1, C), jnp.float32)

    # one soft edge mask per class, length = num_edges + num_nodes (self-loops)
    masks = [jax.random.normal(keys[6 + i], (E + N,), jnp.float32) for i in range(C)]

    processor = ExplanationProcessor((w1, b1, w2, b2), edge_index, N, C)
    collector = XCollector()

    related = processor.forward(x, y, masks, collector, node_idx=None)
    _ = (collector.fidelity, collector.fidelity_inv)   # Fidelity+ / Fidelity-

    # Block on one direct (cached) fused-kernel invocation to prove the Pallas path ran.
    out = processor._eval(x, jnp.stack(masks), jnp.int32(0))
    jax.block_until_ready(out)

    # TODO(synk): XCollector's sparsity/accuracy/stability metrics are not ported
    # (no tensor compute involved; they are pure host-side bookkeeping in dig).
    print("KERNEL_OK")
</pallas_src>

<mosaic_0001>
module attributes {stable_mosaic.version = 11 : i64} {
  func.func @kernel(%arg0: i32, %arg1: memref<1x4x128xf32, #tpu.memory_space<vmem>>, %arg2: memref<128x128xf32, #tpu.memory_space<vmem>>, %arg3: memref<128x128xbf16, #tpu.memory_space<vmem>>, %arg4: memref<1x128xf32, #tpu.memory_space<vmem>>, %arg5: memref<128x128xbf16, #tpu.memory_space<vmem>>, %arg6: memref<1x128xf32, #tpu.memory_space<vmem>>, %arg7: memref<128x128xbf16, #tpu.memory_space<vmem>>, %arg8: memref<1x128xf32, #tpu.memory_space<vmem>>, %arg9: memref<1x4x128xf32, #tpu.memory_space<vmem>>) attributes {dimension_semantics = [#tpu.dimension_semantics<parallel>], iteration_bounds = array<i64: 2>, scalar_prefetch = 0 : i64, scratch_operands = 0 : i64, tpu.core_type = #tpu.core_type<tc>, window_params = [{transform_indices = @transform_0, window_bounds = array<i64: 1, 4, 128>}, {pipeline_mode = #tpu.pipeline_mode<synchronous>, transform_indices = @transform_1, window_bounds = array<i64: 128, 128>}, {pipeline_mode = #tpu.pipeline_mode<synchronous>, transform_indices = @transform_2, window_bounds = array<i64: 128, 128>}, {pipeline_mode = #tpu.pipeline_mode<synchronous>, transform_indices = @transform_3, window_bounds = array<i64: 1, 128>}, {pipeline_mode = #tpu.pipeline_mode<synchronous>, transform_indices = @transform_4, window_bounds = array<i64: 128, 128>}, {pipeline_mode = #tpu.pipeline_mode<synchronous>, transform_indices = @transform_5, window_bounds = array<i64: 1, 128>}, {pipeline_mode = #tpu.pipeline_mode<synchronous>, transform_indices = @transform_6, window_bounds = array<i64: 128, 128>}, {pipeline_mode = #tpu.pipeline_mode<synchronous>, transform_indices = @transform_7, window_bounds = array<i64: 1, 128>}, {transform_indices = @transform_8, window_bounds = array<i64: 1, 4, 128>}]} {
    %c0 = arith.constant 0 : index
    %c0_0 = arith.constant 0 : index
    %c0_1 = arith.constant 0 : index
    %0 = vector.load %arg1[%c0, %c0_0, %c0_1] : memref<1x4x128xf32, #tpu.memory_space<vmem>>, vector<1x4x128xf32>
    %1 = vector.shape_cast %0 : vector<1x4x128xf32> to vector<4x128xf32>
    %c0_2 = arith.constant 0 : index
    %c0_3 = arith.constant 0 : index
    %2 = vector.load %arg2[%c0_2, %c0_3] : memref<128x128xf32, #tpu.memory_space<vmem>>, vector<128x128xf32>
    %3 = vector.extract_strided_slice %1 {offsets = [0, 0], sizes = [1, 128], strides = [1, 1]} : vector<4x128xf32> to vector<1x128xf32>
    %4 = vector.broadcast %3 : vector<1x128xf32> to vector<128x128xf32>
    %5 = arith.mulf %2, %4 : vector<128x128xf32>
    %6 = arith.truncf %5 : vector<128x128xf32> to vector<128x128xbf16>
    %7 = vector.extract_strided_slice %1 {offsets = [1, 0], sizes = [1, 128], strides = [1, 1]} : vector<4x128xf32> to vector<1x128xf32>
    %8 = vector.broadcast %7 : vector<1x128xf32> to vector<128x128xf32>
    %9 = arith.mulf %2, %8 : vector<128x128xf32>
    %10 = arith.truncf %9 : vector<128x128xf32> to vector<128x128xbf16>
    %11 = vector.extract_strided_slice %1 {offsets = [2, 0], sizes = [1, 128], strides = [1, 1]} : vector<4x128xf32> to vector<1x128xf32>
    %12 = vector.broadcast %11 : vector<1x128xf32> to vector<128x128xf32>
    %13 = arith.mulf %2, %12 : vector<128x128xf32>
    %14 = arith.truncf %13 : vector<128x128xf32> to vector<128x128xbf16>
    %15 = vector.extract_strided_slice %1 {offsets = [3, 0], sizes = [1, 128], strides = [1, 1]} : vector<4x128xf32> to vector<1x128xf32>
    %16 = vector.broadcast %15 : vector<1x128xf32> to vector<128x128xf32>
    %17 = arith.mulf %2, %16 : vector<128x128xf32>
    %18 = arith.truncf %17 : vector<128x128xf32> to vector<128x128xbf16>
    %19 = tpu.concatenate %6, %10, %14, %18 in 0 : vector<128x128xbf16>, vector<128x128xbf16>, vector<128x128xbf16>, vector<128x128xbf16> -> vector<512x128xbf16>
    %c0_4 = arith.constant 0 : index
    %c0_5 = arith.constant 0 : index
    %20 = vector.load %arg5[%c0_4, %c0_5] : memref<128x128xbf16, #tpu.memory_space<vmem>>, vector<128x128xbf16>
    %cst = arith.constant dense<0.000000e+00> : vector<512x128xf32>
    %21 = tpu.matmul %19, %20, %cst {dimension_numbers = #tpu.dot_dimension_numbers<[1], [0], [0], [1], [0, 0, 1, 1], [], []>} : vector<512x128xbf16>, vector<128x128xbf16>, vector<512x128xf32> -> vector<512x128xf32>
    %c0_6 = arith.constant 0 : index
    %c0_7 = arith.constant 0 : index
    %22 = vector.load %arg6[%c0_6, %c0_7] : memref<1x128xf32, #tpu.memory_space<vmem>>, vector<1x128xf32>
    %23 = vector.broadcast %22 : vector<1x128xf32> to vector<512x128xf32>
    %24 = arith.addf %21, %23 : vector<512x128xf32>
    %cst_8 = arith.constant 0.000000e+00 : f32
    %25 = vector.broadcast %cst_8 : f32 to vector<512x128xf32>
    %26 = arith.maximumf %24, %25 : vector<512x128xf32>
    %27 = arith.truncf %26 : vector<512x128xf32> to vector<512x128xbf16>
    %c0_9 = arith.constant 0 : index
    %c0_10 = arith.constant 0 : index
    %28 = vector.load %arg4[%c0_9, %c0_10] : memref<1x128xf32, #tpu.memory_space<vmem>>, vector<1x128xf32>
    %29 = vector.broadcast %28 : vector<1x128xf32> to vector<4x128xf32>
    %30 = arith.mulf %29, %1 : vector<4x128xf32>
    %31 = arith.truncf %30 : vector<4x128xf32> to vector<4x128xbf16>
    %c0_11 = arith.constant 0 : index
    %c0_12 = arith.constant 0 : index
    %32 = vector.load %arg3[%c0_11, %c0_12] : memref<128x128xbf16, #tpu.memory_space<vmem>>, vector<128x128xbf16>
    %cst_13 = arith.constant dense<0.000000e+00> : vector<4x128xf32>
    %33 = tpu.matmul %31, %32, %cst_13 {dimension_numbers = #tpu.dot_dimension_numbers<[1], [0], [0], [1], [0, 0, 1, 1], [], []>} : vector<4x128xbf16>, vector<128x128xbf16>, vector<4x128xf32> -> vector<4x128xf32>
    %34 = tpu.iota {dimensions = array<i32: 0>} : vector<4x128xi32>
    %c0_i32 = arith.constant 0 : i32
    %35 = vector.broadcast %c0_i32 : i32 to vector<4x128xi32>
    %36 = arith.cmpi eq, %34, %35 : vector<4x128xi32>
    %cst_14 = arith.constant 0.000000e+00 : f32
    %37 = vector.broadcast %cst_14 : f32 to vector<4x128xf32>
    %38 = arith.select %36, %33, %37 : vector<4x128xi1>, vector<4x128xf32>
    %39 = tpu.iota {dimensions = array<i32: 0>} : vector<4x128xi32>
    %c1_i32 = arith.constant 1 : i32
    %40 = vector.broadcast %c1_i32 : i32 to vector<4x128xi32>
    %41 = arith.cmpi eq, %39, %40 : vector<4x128xi32>
    %cst_15 = arith.constant 0.000000e+00 : f32
    %42 = vector.broadcast %cst_15 : f32 to vector<4x128xf32>
    %43 = arith.select %41, %33, %42 : vector<4x128xi1>, vector<4x128xf32>
    %44 = tpu.iota {dimensions = array<i32: 0>} : vector<4x128xi32>
    %c2_i32 = arith.constant 2 : i32
    %45 = vector.broadcast %c2_i32 : i32 to vector<4x128xi32>
    %46 = arith.cmpi eq, %44, %45 : vector<4x128xi32>
    %cst_16 = arith.constant 0.000000e+00 : f32
    %47 = vector.broadcast %cst_16 : f32 to vector<4x128xf32>
    %48 = arith.select %46, %33, %47 : vector<4x128xi1>, vector<4x128xf32>
    %49 = tpu.iota {dimensions = array<i32: 0>} : vector<4x128xi32>
    %c3_i32 = arith.constant 3 : i32
    %50 = vector.broadcast %c3_i32 : i32 to vector<4x128xi32>
    %51 = arith.cmpi eq, %49, %50 : vector<4x128xi32>
    %cst_17 = arith.constant 0.000000e+00 : f32
    %52 = vector.broadcast %cst_17 : f32 to vector<4x128xf32>
    %53 = arith.select %51, %33, %52 : vector<4x128xi1>, vector<4x128xf32>
    %54 = tpu.concatenate %38, %43, %48, %53 in 1 : vector<4x128xf32>, vector<4x128xf32>, vector<4x128xf32>, vector<4x128xf32> -> vector<4x512xf32>
    %55 = arith.truncf %54 : vector<4x512xf32> to vector<4x512xbf16>
    %cst_18 = arith.constant dense<0.000000e+00> : vector<4x128xf32>
    %56 = tpu.matmul %55, %27, %cst_18 {dimension_numbers = #tpu.dot_dimension_numbers<[1], [0], [0], [1], [0, 0, 1, 1], [], []>} : vector<4x512xbf16>, vector<512x128xbf16>, vector<4x128xf32> -> vector<4x128xf32>
    %57 = arith.truncf %56 : vector<4x128xf32> to vector<4x128xbf16>
    %c0_19 = arith.constant 0 : index
    %c0_20 = arith.constant 0 : index
    %58 = vector.load %arg7[%c0_19, %c0_20] : memref<128x128xbf16, #tpu.memory_space<vmem>>, vector<128x128xbf16>
    %cst_21 = arith.constant dense<0.000000e+00> : vector<4x128xf32>
    %59 = tpu.matmul %57, %58, %cst_21 {dimension_numbers = #tpu.dot_dimension_numbers<[1], [0], [0], [1], [0, 0, 1, 1], [], []>} : vector<4x128xbf16>, vector<128x128xbf16>, vector<4x128xf32> -> vector<4x128xf32>
    %c0_22 = arith.constant 0 : index
    %c0_23 = arith.constant 0 : index
    %60 = vector.load %arg8[%c0_22, %c0_23] : memref<1x128xf32, #tpu.memory_space<vmem>>, vector<1x128xf32>
    %61 = vector.broadcast %60 : vector<1x128xf32> to vector<4x128xf32>
    %62 = arith.addf %59, %61 : vector<4x128xf32>
    %c0_24 = arith.constant 0 : index
    %c0_25 = arith.constant 0 : index
    %c0_26 = arith.constant 0 : index
    %63 = vector.load %arg9[%c0_24, %c0_25, %c0_26] : memref<1x4x128xf32, #tpu.memory_space<vmem>>, vector<1x4x128xf32>
    %64 = vector.shape_cast %63 : vector<1x4x128xf32> to vector<4x128xf32>
    %65 = vector.shape_cast %62 : vector<4x128xf32> to vector<1x4x128xf32>
    tpu.vector_store %arg9[%c0_24, %c0_25, %c0_26], %65 {strides = array<i32>} : memref<1x4x128xf32, #tpu.memory_space<vmem>>, vector<1x4x128xf32>,
    return
  }
  func.func @transform_0(%arg0: i32) -> (i32, i32, i32) {
    %c0_i32 = arith.constant 0 : i32
    %c0_i32_0 = arith.constant 0 : i32
    %c0_i32_1 = arith.constant 0 : i32
    return %arg0, %c0_i32, %c0_i32_0 : i32, i32, i32
  }
  func.func @transform_1(%arg0: i32) -> (i32, i32) {
    %c0_i32 = arith.constant 0 : i32
    %c0_i32_0 = arith.constant 0 : i32
    %c0_i32_1 = arith.constant 0 : i32
    return %c0_i32, %c0_i32_0 : i32, i32
  }
  func.func @transform_2(%arg0: i32) -> (i32, i32) {
    %c0_i32 = arith.constant 0 : i32
    %c0_i32_0 = arith.constant 0 : i32
    %c0_i32_1 = arith.constant 0 : i32
    return %c0_i32, %c0_i32_0 : i32, i32
  }
  func.func @transform_3(%arg0: i32) -> (i32, i32) {
    %c0_i32 = arith.constant 0 : i32
    %c0_i32_0 = arith.constant 0 : i32
    %c0_i32_1 = arith.constant 0 : i32
    return %c0_i32, %c0_i32_0 : i32, i32
  }
  func.func @transform_4(%arg0: i32) -> (i32, i32) {
    %c0_i32 = arith.constant 0 : i32
    %c0_i32_0 = arith.constant 0 : i32
    %c0_i32_1 = arith.constant 0 : i32
    return %c0_i32, %c0_i32_0 : i32, i32
  }
  func.func @transform_5(%arg0: i32) -> (i32, i32) {
    %c0_i32 = arith.constant 0 : i32
    %c0_i32_0 = arith.constant 0 : i32
    %c0_i32_1 = arith.constant 0 : i32
    return %c0_i32, %c0_i32_0 : i32, i32
  }
  func.func @transform_6(%arg0: i32) -> (i32, i32) {
    %c0_i32 = arith.constant 0 : i32
    %c0_i32_0 = arith.constant 0 : i32
    %c0_i32_1 = arith.constant 0 : i32
    return %c0_i32, %c0_i32_0 : i32, i32
  }
  func.func @transform_7(%arg0: i32) -> (i32, i32) {
    %c0_i32 = arith.constant 0 : i32
    %c0_i32_0 = arith.constant 0 : i32
    %c0_i32_1 = arith.constant 0 : i32
    return %c0_i32, %c0_i32_0 : i32, i32
  }
  func.func @transform_8(%arg0: i32) -> (i32, i32, i32) {
    %c0_i32 = arith.constant 0 : i32
    %c0_i32_0 = arith.constant 0 : i32
    %c0_i32_1 = arith.constant 0 : i32
    return %arg0, %c0_i32, %c0_i32_0 : i32, i32, i32
  }
}

</mosaic_0001>

<bundles_post_ra>
// kernel: _eval_impl.1
= control target key start
LH: loop header
LB: loop body
LE: loop exit
PB: predicated region body
PF: predicated region fallthrough
CT: control target
= control target key end

     0   :  { %s1619_s27 = smov 0   ;;  %s2220_s0 = inlined_call_operand.vmem [shape: f32[2,4,128], index: 0, kind: input, shape index: {}]   ;;  %s2221_s1 = inlined_call_operand.vmem [shape: f32[128,128], index: 1, kind: input, shape index: {}]   ;;  %s2222_s2 = inlined_call_operand.vmem [shape: bf16[128,128], index: 2, kind: input, shape index: {}]   ;;  %s2223_s3 = inlined_call_operand.vmem [shape: f32[1,128], index: 3, kind: input, shape index: {}]   ;;  %s2224_s4 = inlined_call_operand.vmem [shape: bf16[128,128], index: 4, kind: input, shape index: {}]   ;;  %s2225_s5 = inlined_call_operand.vmem [shape: f32[1,128], index: 5, kind: input, shape index: {}]   ;;  %s2226_s6 = inlined_call_operand.vmem [shape: bf16[128,128], index: 6, kind: input, shape index: {}]   ;;  %s2227_s7 = inlined_call_operand.vmem [shape: f32[1,128], index: 7, kind: input, shape index: {}]   ;;  %s2228_s8 = inlined_call_operand.vmem [shape: f32[2,4,128], index: 8, kind: output, shape index: {}]  }
   0x1 LB: > { %s1260_s28 = sadd.s32 4294967295, %s1570_s27   ;;  %p1264_p0 = scmp.ge.s32.totalorder %s1570_s27, 1  ;;  %s1570_s27 = sphi %s1619_s27, %s18_s27  }
   0x2   : > { %p261_p1 = scmp.lt.s32.totalorder %s1570_s27, 3 }
   0x4   : > { %p262_p2 = pnand %p1264_p0, %p261_p1 }
   0x6   : > { %265 = sbr.rel (%p262_p2) target bundleno = 829 (0x33d), region = 52 }
   0xd   : > { %v1540_v0 = vld [vmem:[%s2224_s4] sm:$0xff]   ;;  %p293_p3 = scmp.lt.s32.totalorder %s1260_s28, 1  ;;  %v319_v1 = vlaneseq  ;;  %v1541_v2 = vld [vmem:[%s2224_s4 + $0x8] sm:$0xff]   ;;  %v2230_v3 = vmov 0.0   ;;  %v1542_v5 = vld [vmem:[%s2224_s4 + $0x10] sm:$0xff]   ;;  %vm1573_vm0 = vmmov 0  }
   0xe   : > { %1410 = vmatprep.subr.bf16.mxu0 %v1540_v0  ;;  %1490 = vmatprep.subr.bf16.mxu1 %v2230_v3  ;;  %v1543_v7 = vld [vmem:[%s2224_s4 + $0x18] sm:$0xff]   ;;  %v1656_v9 = vld [vmem:[%s2221_s1] sm:$0xff]  ;;  %v1661_v10 = vld [vmem:[%s2221_s1 + $0x8] sm:$0xff] }
   0xf   : > { %s2259_s28 = smov (!%p293_p3, %s1260_s28), 1  ;;  %1411 = vmatpush3.bf16.msra.mxu0 %v1540_v0  ;;  %v1636_v4 = vshrl.u32 %v319_v1, 7  ;;  %1506 = vmatprep.mubr.msk.bf16.mxu1 %vm1573_vm0, %v2230_v3  ;;  %v1544_v14 = vld [vmem:[%s2224_s4 + $0x20] sm:$0xff]   ;;  %v1545_v16 = vld [vmem:[%s2224_s4 + $0x28] sm:$0xff]   ;;  %v1685_v19 = vld [vmem:[%s2221_s1 + $0x10] sm:$0xff] }
  0x10   : > { %1412 = vmatprep.subr.bf16.mxu0 %v1541_v2  ;;  %s1265_s13 = sshll.u32 %s2259_s28, 2  ;;  %v1548_v18 = vld [vmem:[%s2222_s2] sm:$0xff]   ;;  %v1690_v20 = vld [vmem:[%s2221_s1 + $0x18] sm:$0xff]  ;;  %v1549_v21 = vld [vmem:[%s2222_s2 + $0x8] sm:$0xff]  }
  0x11   : > { %2235 = vst [vmem:[#allocation2_spill] sm:$0xff] %v1636_v4  ;;  %s296_s16 = scalar_lea.vmem %s2220_s0, %s1265_s13  ;;  %v321_v6 = vsub.s32 0, %v1636_v4  ;;  %v377_v17 = vsub.s32 2, %v1636_v4  ;;  %1491 = vmatpush3.bf16.msra.mxu1 %v1548_v18  ;;  %v1546_v22 = vld [vmem:[%s2224_s4 + $0x30] sm:$0xff]   ;;  %v1701_v23 = vld [vmem:[%s2221_s1 + $0x20] sm:$0xff]  ;;  %v405_v25 = vsub.s32 3, %v1636_v4  ;;  %s300_s23 = scalar_lea.vmem %s2228_s8, %s1265_s13 }
  0x12   : > { %v1651_v8 = vld [vmem:[%s296_s16] sm:$0xf]  ;;  %1492 = vmatprep.subr.bf16.mxu1 %v2230_v3  ;;  %v1709_v26 = vld [vmem:[%s2221_s1 + $0x28] sm:$0xff]  ;;  %v1722_v29 = vld [vmem:[%s2221_s1 + $0x30] sm:$0xff] }
  0x13   : > { %1413 = vmatpush3.bf16.msra.mxu0 %v1541_v2  ;;  %v1664_v11 = vrot.slane %v1651_v8, %v321_v6  ;;  %v378_v24 = vrot.slane %v1651_v8, %v377_v17  ;;  %v1550_v30 = vld [vmem:[%s2222_s2 + $0x10] sm:$0xff]   ;;  %v1547_v31 = vld [vmem:[%s2224_s4 + $0x38] sm:$0xff]   ;;  %v1746_v35 = vld [vmem:[%s2221_s1 + $0x40] sm:$0xff]  ;;  %v1753_v37 = vrot.slane %v1651_v8, %v405_v25 }
  0x14   : > { %1414 = vmatprep.subr.bf16.mxu0 %v1542_v5  ;;  %v1741_v34 = vld [vmem:[%s2221_s1 + $0x38] sm:$0xff]  ;;  %v1762_v39 = vld [vmem:[%s2221_s1 + $0x48] sm:$0xff]  ;;  %v1767_v40 = vld [vmem:[%s2221_s1 + $0x50] sm:$0xff] }
  0x15   : > { %v323_v12 = vmul.f32 %v1664_v11, %v1656_v9  ;;  %v324_v13 = vmul.f32 %v1664_v11, %v1661_v10  ;;  %v1713_v27 = vmul.f32 %v1664_v11, %v1685_v19  ;;  %v1717_v28 = vmul.f32 %v1664_v11, %v1690_v20  ;;  %1493 = vmatpush3.bf16.msra.mxu1 %v1549_v21  ;;  %v1772_v41 = vld [vmem:[%s2221_s1 + $0x58] sm:$0xff]  ;;  %v1791_v47 = vld [vmem:[%s2221_s1 + $0x60] sm:$0xff]  ;;  %v1796_v48 = vld [vmem:[%s2221_s1 + $0x68] sm:$0xff] }
  0x16   : > { %v1732_v32 = vmul.f32 %v1664_v11, %v1701_v23  ;;  %v1736_v33 = vmul.f32 %v1664_v11, %v1709_v26  ;;  %v1749_v36 = vmul.f32 %v378_v24, %v1656_v9  ;;  %1494 = vmatprep.subr.bf16.mxu1 %v2230_v3  ;;  %v1757_v38 = vmul.f32 %v1664_v11, %v1722_v29  ;;  %v1551_v45 = vld [vmem:[%s2222_s2 + $0x18] sm:$0xff]   ;;  %v1801_v49 = vld [vmem:[%s2221_s1 + $0x70] sm:$0xff]  ;;  %v1276_v57 = vld [vmem:[%s2223_s3] ss:$0 sm:$0xff] }
  0x17   : > { %1415 = vmatpush3.bf16.msra.mxu0 %v1542_v5  ;;  %v339_v15 = vpack.c.bf16 %v324_v13, %v323_v12  ;;  %v1775_v42 = vmul.f32 %v378_v24, %v1661_v10  ;;  %v1778_v43 = vmul.f32 %v378_v24, %v1685_v19  ;;  %v1781_v44 = vmul.f32 %v378_v24, %v1690_v20  ;;  %v1837_v61 = vld [vmem:[%s2221_s1 + $0x78] sm:$0xff]  ;;  %v1552_v12 = vld [vmem:[%s2222_s2 + $0x20] sm:$0xff]  }
  0x18   : > { %1416 = vmatprep.subr.bf16.mxu0 %v1543_v7  ;;  %v340_v46 = vpack.c.bf16 %v1717_v28, %v1713_v27  ;;  %v1804_v50 = vmul.f32 %v378_v24, %v1701_v23  ;;  %v1807_v51 = vmul.f32 %v378_v24, %v1709_v26  ;;  %v1810_v52 = vmul.f32 %v378_v24, %v1722_v29 }
  0x19   : > { %1426 = vmatprep.mubr.bf16.mxu0 %v339_v15  ;;  %v1817_v55 = vmul.f32 %v378_v24, %v1741_v34  ;;  %1495 = vmatpush3.bf16.msra.mxu1 %v1550_v30  ;;  %v1820_v56 = vmul.f32 %v378_v24, %v1746_v35  ;;  %v1825_v58 = vmul.f32 %v378_v24, %v1762_v39 }
  0x1a   : > { %1496 = vmatprep.subr.bf16.mxu1 %v2230_v3  ;;  %v1829_v59 = vmul.f32 %v378_v24, %v1767_v40  ;;  %v1832_v60 = vmul.f32 %v378_v24, %v1772_v41  ;;  %v1842_v63 = vmul.f32 %v378_v24, %v1791_v47  ;;  %v1845_v0 = vmul.f32 %v378_v24, %v1796_v48 }
  0x1b   : > { %1417 = vmatpush3.bf16.msra.mxu0 %v1543_v7  ;;  %v1848_v1 = vmul.f32 %v378_v24, %v1801_v49  ;;  %v1855_v6 = vmul.f32 %v378_v24, %v1837_v61  ;;  %v1859_v7 = vmul.f32 %v1753_v37, %v1656_v9  ;;  %v1872_v15 = vmul.f32 %v1753_v37, %v1685_v19 }
  0x1c   : > { %1418 = vmatprep.subr.bf16.mxu0 %v1544_v14  ;;  %v341_v17 = vpack.c.bf16 %v1736_v33, %v1732_v32  ;;  %v1885_v21 = vmul.f32 %v1753_v37, %v1701_v23  ;;  %v1897_v27 = vmul.f32 %v1753_v37, %v1722_v29  ;;  %v1901_v28 = vmul.f32 %v1753_v37, %v1741_v34 }
  0x1d   : > { %1497 = vmatpush3.bf16.msra.mxu1 %v1551_v45  ;;  %v330_v30 = vmul.f32 %v1664_v11, %v1741_v34  ;;  %v1909_v32 = vmul.f32 %v1753_v37, %v1746_v35  ;;  %v1913_v33 = vmul.f32 %v1753_v37, %v1762_v39  ;;  %v1553_v45 = vld [vmem:[%s2222_s2 + $0x28] sm:$0xff]   ;;  %v1922_v24 = vmul.f32 %v1753_v37, %v1767_v40 }
  0x1e   : > { %1498 = vmatprep.subr.bf16.mxu1 %v2230_v3  ;;  %v1930_v18 = vmul.f32 %v1753_v37, %v1791_v47  ;;  %v1937_v25 = vmul.f32 %v1753_v37, %v1796_v48  ;;  %v1941_v13 = vmul.f32 %v1753_v37, %v1801_v49  ;;  %v331_v5 = vmul.f32 %v1664_v11, %v1746_v35 }
  0x1f   : > { %1419 = vmatpush3.bf16.msra.mxu0 %v1544_v14  ;;  %v1868_v14 = vmul.f32 %v1753_v37, %v1661_v10  ;;  %v342_v2 = vpack.c.bf16 %v330_v30, %v1757_v38  ;;  %v894_v53 = vmul.f32 %v1276_v57, %v1651_v8  ;;  %v333_v62 = vmul.f32 %v1664_v11, %v1767_v40 }
  0x20   : > { %1420 = vmatprep.subr.bf16.mxu0 %v1545_v16  ;;  %2236 = vst [vmem:[#allocation3_spill] sm:$0xff] %v1930_v18  ;;  %2237 = vst [vmem:[#allocation4_spill] sm:$0xff] %v1941_v13  ;;  %v334_v18 = vmul.f32 %v1664_v11, %v1772_v41  ;;  %v335_v38 = vmul.f32 %v1664_v11, %v1791_v47  ;;  %v336_v57 = vmul.f32 %v1664_v11, %v1796_v48 }
  0x21   : > { %1499 = vmatpush3.bf16.msra.mxu1 %v1552_v12  ;;  %v1951_v12 = vmul.f32 %v1753_v37, %v1837_v61  ;;  %v895_v30 = vpack.c.bf16 %v894_v53, %v894_v53 }
  0x22   : > { %1500 = vmatprep.subr.bf16.mxu1 %v2230_v3 }
  0x23   : > { %1421 = vmatpush3.bf16.msra.mxu0 %v1545_v16  ;;  %v1876_v16 = vmul.f32 %v1753_v37, %v1690_v20 }
  0x24   : > { %1422 = vmatprep.subr.bf16.mxu0 %v1546_v22 }
  0x25   : > { %1501 = vmatpush3.bf16.msra.mxu1 %v1553_v45  ;;  %v1555_v45 = vld [vmem:[%s2222_s2 + $0x38] sm:$0xff]  }
  0x26   : > { %1502 = vmatprep.subr.bf16.mxu1 %v2230_v3 }
  0x27   : > { %1423 = vmatpush3.bf16.msra.mxu0 %v1546_v22  ;;  %v1889_v22 = vmul.f32 %v1753_v37, %v1709_v26 }
  0x28   : > { %1424 = vmatprep.subr.bf16.mxu0 %v1547_v31 }
  0x2b   : > { %1425 = vmatpush3.bf16.msra.mxu0 %v1547_v31  ;;  %v1926_v31 = vmul.f32 %v1753_v37, %v1772_v41 }
  0x2e   : > { %1427 = vmatmul.mubr.bf16.vlgmr.msra.gmra.mrb[0].mxu0 %v340_v46  ;;  %v332_v46 = vmul.f32 %v1664_v11, %v1762_v39 }
  0x2f   : > { %1430 = vmatprep.mubr.bf16.mxu0 %v341_v17  ;;  %v1554_v17 = vld [vmem:[%s2222_s2 + $0x30] sm:$0xff]  }
  0x30   : > { %v343_v37 = vpack.c.bf16 %v332_v46, %v331_v5  ;;  %1503 = vmatpush3.bf16.msra.mxu1 %v1554_v17  ;;  %v349_v5 = vsub.s32 1, %v1636_v4  ;;  %v345_v46 = vpack.c.bf16 %v336_v57, %v335_v38 }
  0x31   : > { %1504 = vmatprep.subr.bf16.mxu1 %v2230_v3  ;;  %v337_v3 = vmul.f32 %v1664_v11, %v1801_v49 }
  0x32   : > { %v350_v17 = vrot.slane %v1651_v8, %v349_v5 }
  0x34   : > { %1505 = vmatpush3.bf16.msra.mxu1 %v1555_v45  ;;  %v351_v54 = vmul.f32 %v350_v17, %v1656_v9  ;;  %v352_v13 = vmul.f32 %v350_v17, %v1661_v10  ;;  %v354_v8 = vmul.f32 %v350_v17, %v1690_v20  ;;  %v356_v45 = vmul.f32 %v350_v17, %v1709_v26 }
  0x35   : > { %v358_v9 = vmul.f32 %v350_v17, %v1741_v34  ;;  %v361_v20 = vmul.f32 %v350_v17, %v1767_v40  ;;  %v363_v26 = vmul.f32 %v350_v17, %v1791_v47  ;;  %v365_v34 = vmul.f32 %v350_v17, %v1801_v49 }
  0x36   : > { %1431 = vmatmul.mubr.bf16.gmra.mrb[4].mxu0 %v342_v2  ;;  %v344_v2 = vpack.c.bf16 %v334_v18, %v333_v62  ;;  %v367_v53 = vpack.c.bf16 %v352_v13, %v351_v54  ;;  %v353_v62 = vmul.f32 %v350_v17, %v1685_v19  ;;  %v355_v18 = vmul.f32 %v350_v17, %v1701_v23 }
  0x37   : > { %1434 = vmatprep.mubr.bf16.mxu0 %v343_v37  ;;  %1507 = vmatmul.mubr.bf16.vlgmr.msra.gmra.mrb[0].mxu1 %v895_v30  ;;  %v338_v37 = vmul.f32 %v1664_v11, %v1837_v61  ;;  %v357_v11 = vmul.f32 %v350_v17, %v1722_v29  ;;  %v362_v23 = vmul.f32 %v350_v17, %v1772_v41 }
  0x38   : > { %v368_v38 = vpack.c.bf16 %v354_v8, %v353_v62  ;;  %v369_v57 = vpack.c.bf16 %v356_v45, %v355_v18  ;;  %v364_v54 = vmul.f32 %v350_v17, %v1796_v48  ;;  %v2238_v40 = vpack.c.bf16 %v1775_v42, %v1749_v36 }
  0x39   : > { %v346_v4 = vpack.c.bf16 %v338_v37, %v337_v3  ;;  %v359_v3 = vmul.f32 %v350_v17, %v1746_v35  ;;  %v370_v10 = vpack.c.bf16 %v358_v9, %v357_v11  ;;  %v372_v29 = vpack.c.bf16 %v362_v23, %v361_v20 }
  0x3a   : > { %v373_v13 = vpack.c.bf16 %v364_v54, %v363_v26  ;;  %v366_v35 = vmul.f32 %v350_v17, %v1837_v61  ;;  %v2239_v41 = vpack.c.bf16 %v1781_v44, %v1778_v43  ;;  %v2240_v47 = vpack.c.bf16 %v1807_v51, %v1804_v50 }
  0x3b   : > { %v2241_v48 = vpack.c.bf16 %v1817_v55, %v1810_v52  ;;  %v2242_v49 = vpack.c.bf16 %v1825_v58, %v1820_v56  ;;  %v2243_v36 = vpack.c.bf16 %v1832_v60, %v1829_v59  ;;  %v2244_v42 = vpack.c.bf16 %v1845_v0, %v1842_v63  ;;  %v2252_v58 = vld [vmem:[#allocation3_spill] sm:$0xff]  ;;  %v2254_v60 = vld [vmem:[#allocation4_spill] sm:$0xff]  ;;  %v2051_v63 = vld [vmem:[%s2225_s5] ss:$0 sm:$0xff] }
  0x3c   : > { %v2245_v43 = vpack.c.bf16 %v1855_v6, %v1848_v1  ;;  %v2246_v44 = vpack.c.bf16 %v1868_v14, %v1859_v7  ;;  %v2247_v50 = vpack.c.bf16 %v1876_v16, %v1872_v15  ;;  %v2248_v51 = vpack.c.bf16 %v1889_v22, %v1885_v21 }
  0x3d   : > { %v2249_v52 = vpack.c.bf16 %v1901_v28, %v1897_v27  ;;  %v2250_v55 = vpack.c.bf16 %v1913_v33, %v1909_v32  ;;  %v2251_v56 = vpack.c.bf16 %v1926_v31, %v1922_v24  ;;  %v2253_v59 = vpack.c.bf16 %v1937_v25, %v2252_v58 }
  0x3e   : > { %1435 = vmatmul.mubr.bf16.gmra.mrb[8].mxu0 %v344_v2  ;;  %v2255_v61 = vpack.c.bf16 %v1951_v12, %v2254_v60 }
  0x3f   : > { %1438 = vmatprep.mubr.bf16.mxu0 %v345_v46 }
  0x46   : > { %1439 = vmatmul.mubr.bf16.gmra.mrb[12].mxu0 %v346_v4  ;;  %v360_v4 = vmul.f32 %v350_v17, %v1762_v39  ;;  %v374_v39 = vpack.c.bf16 %v366_v35, %v365_v34  ;;  %v2256_v17 = vld [vmem:[#allocation2_spill] sm:$0xff] }
  0x47   : > { %1442 = vmatprep.mubr.bf16.mxu0 %v367_v53  ;;  %vm1004_vm1 = vcmp.eq.s32.totalorder %v2256_v17, 1  ;;  %vm1002_vm3 = vcmp.eq.s32.totalorder %v2256_v17, 0  ;;  %vm1008_vm4 = vcmp.eq.s32.totalorder %v2256_v17, 3  ;;  %vm1006_vm7 = vcmp.eq.s32.totalorder %v2256_v17, 2  ;;  %v1558_v17 = vld [vmem:[%s2226_s6 + $0x10] sm:$0xff]  }
  0x48   : > { %v371_v19 = vpack.c.bf16 %v360_v4, %v359_v3  ;;  %vm1285_vm2 = vmpackc.low %vm1004_vm1, %vm1004_vm1 }
  0x49   : > { %vm1288_vm5 = vmpackc.low %vm1002_vm3, %vm1002_vm3 }
  0x4a   : > { %vm1291_vm6 = vmpackc.low %vm1008_vm4, %vm1008_vm4 }
  0x4b   : > { %vm1294_vm8 = vmpackc.low %vm1006_vm7, %vm1006_vm7 }
  0x4e   : > { %1443 = vmatmul.mubr.bf16.gmra.mrb[16].mxu0 %v368_v38 }
  0x4f   : > { %1446 = vmatprep.mubr.bf16.mxu0 %v369_v57 }
  0x56   : > { %1447 = vmatmul.mubr.bf16.gmra.mrb[20].mxu0 %v370_v10 }
  0x57   : > { %1450 = vmatprep.mubr.bf16.mxu0 %v371_v19 }
  0x5e   : > { %1451 = vmatmul.mubr.bf16.gmra.mrb[24].mxu0 %v372_v29 }
  0x5f   : > { %1454 = vmatprep.mubr.bf16.mxu0 %v373_v13 }
  0x66   : > { %1455 = vmatmul.mubr.bf16.gmra.mrb[28].mxu0 %v374_v39 }
  0x67   : > { %1458 = vmatprep.mubr.bf16.mxu0 %v2238_v40 }
  0x6e   : > { %1459 = vmatmul.mubr.bf16.gmra.mrb[32].mxu0 %v2239_v41 }
  0x6f   : > { %1462 = vmatprep.mubr.bf16.mxu0 %v2240_v47 }
  0x76   : > { %1463 = vmatmul.mubr.bf16.gmra.mrb[36].mxu0 %v2241_v48 }
  0x77   : > { %1466 = vmatprep.mubr.bf16.mxu0 %v2242_v49 }
  0x7e   : > { %1467 = vmatmul.mubr.bf16.gmra.mrb[40].mxu0 %v2243_v36 }
  0x7f   : > { %1470 = vmatprep.mubr.bf16.mxu0 %v2244_v42 }
  0x86   : > { %1471 = vmatmul.mubr.bf16.gmra.mrb[44].mxu0 %v2245_v43 }
  0x87   : > { %1474 = vmatprep.mubr.bf16.mxu0 %v2246_v44 }
  0x8e   : > { %1475 = vmatmul.mubr.bf16.gmra.mrb[48].mxu0 %v2247_v50 }
  0x8f   : > { %1478 = vmatprep.mubr.bf16.mxu0 %v2248_v51 }
  0x96   : > { %1479 = vmatmul.mubr.bf16.gmra.mrb[52].mxu0 %v2249_v52 }
  0x97   : > { %1482 = vmatprep.mubr.bf16.mxu0 %v2250_v55 }
  0x9e   : > { %1483 = vmatmul.mubr.bf16.gmra.mrb[56].mxu0 %v2251_v56 }
  0x9f   : > { %1486 = vmatprep.mubr.bf16.mxu0 %v2253_v59 }
  0xa6   : > { %1487 = vmatmul.mubr.bf16.gmra.mrb[60].mxu0 %v2255_v61 }
 0x101   : > { %v1428_v0 = vpop.f32.mrb[0].mxu0 }
 0x102   : > { %v545_v1 = vadd.f32 %v1428_v0, %v2051_v63  ;;  %v536_v6 = vpop.f32.mrb[1].mxu0 }
 0x103   : > { %v537_v7 = vadd.f32 %v2051_v63, %v536_v6  ;;  %v1429_v14 = vpop.f32.mrb[2].mxu0 }
 0x104   : > { %v548_v15 = vadd.f32 %v1429_v14, %v2051_v63  ;;  %v539_v16 = vpop.f32.mrb[3].mxu0  ;;  %v793_v22 = vmax.f32 %v545_v1, 0.0 }
 0x105   : > { %v540_v21 = vadd.f32 %v2051_v63, %v539_v16  ;;  %v791_v25 = vmax.f32 %v537_v7, 0.0 }
 0x106   : > { %v794_v24 = vmax.f32 %v548_v15, 0.0 }
 0x107   : > { %v792_v27 = vmax.f32 %v540_v21, 0.0 }
 0x108   : > { %v2057_v28 = vpack.c.bf16 %v794_v24, %v793_v22 }
 0x109   : > { %v2059_v31 = vpack.c.bf16 %v792_v27, %v791_v25  ;;  %v1432_v32 = vpop.f32.mrb[4].mxu0 }
 0x10a   : > { %v561_v33 = vadd.f32 %v1432_v32, %v2051_v63  ;;  %v552_v12 = vpop.f32.mrb[5].mxu0  ;;  %v994_v45 = vpop.f32.mrb[0].mxu1 }
 0x10b   : > { %v553_v5 = vadd.f32 %v2051_v63, %v552_v12  ;;  %v1433_v30 = vpop.f32.mrb[6].mxu0  ;;  %v2068_v57 = vpack.c.bf16 %v994_v45, %v994_v45  ;;  %v1508_v11 = vpop.f32.mrb[1].mxu1 }
 0x10c   : > { %v564_v2 = vadd.f32 %v1433_v30, %v2051_v63  ;;  %v555_v46 = vpop.f32.mrb[7].mxu0  ;;  %v797_v53 = vmax.f32 %v561_v33, 0.0  ;;  %v997_v4 = vpop.f32.mrb[2].mxu1 }
 0x10d   : > { %v556_v37 = vadd.f32 %v2051_v63, %v555_v46  ;;  %v795_v8 = vmax.f32 %v553_v5, 0.0  ;;  %1287 = vmatprep.mubr.msk.bf16.mxu1 %vm1285_vm2, %v2068_v57  ;;  %v1509_v20 = vpop.f32.mrb[3].mxu1 }
 0x10e   : > { %v798_v62 = vmax.f32 %v564_v2, 0.0 }
 0x10f   : > { %v796_v18 = vmax.f32 %v556_v37, 0.0 }
 0x110   : > { %v2066_v38 = vpack.c.bf16 %v798_v62, %v797_v53 }
 0x111   : > { %v2070_v9 = vpack.c.bf16 %v796_v18, %v795_v8  ;;  %v1436_v3 = vpop.f32.mrb[8].mxu0 }
 0x112   : > { %v577_v10 = vadd.f32 %v1436_v3, %v2051_v63  ;;  %v568_v19 = vpop.f32.mrb[9].mxu0 }
 0x113   : > { %v569_v23 = vadd.f32 %v2051_v63, %v568_v19  ;;  %v1437_v26 = vpop.f32.mrb[10].mxu0 }
 0x114   : > { %v580_v54 = vadd.f32 %v1437_v26, %v2051_v63  ;;  %v571_v29 = vpop.f32.mrb[11].mxu0  ;;  %v801_v34 = vmax.f32 %v577_v10, 0.0 }
 0x115   : > { %v572_v13 = vadd.f32 %v2051_v63, %v571_v29  ;;  %v799_v39 = vmax.f32 %v569_v23, 0.0 }
 0x116   : > { %v802_v35 = vmax.f32 %v580_v54, 0.0 }
 0x117   : > { %v800_v40 = vmax.f32 %v572_v13, 0.0 }
 0x118   : > { %v2077_v41 = vpack.c.bf16 %v802_v35, %v801_v34 }
 0x119   : > { %v2079_v47 = vpack.c.bf16 %v800_v40, %v799_v39  ;;  %v1440_v48 = vpop.f32.mrb[12].mxu0 }
 0x11a   : > { %v593_v49 = vadd.f32 %v1440_v48, %v2051_v63  ;;  %v584_v36 = vpop.f32.mrb[13].mxu0 }
 0x11b   : > { %v585_v42 = vadd.f32 %v2051_v63, %v584_v36  ;;  %v1441_v43 = vpop.f32.mrb[14].mxu0 }
 0x11c   : > { %v596_v44 = vadd.f32 %v1441_v43, %v2051_v63  ;;  %v587_v50 = vpop.f32.mrb[15].mxu0  ;;  %v805_v52 = vmax.f32 %v593_v49, 0.0 }
 0x11d   : > { %v588_v51 = vadd.f32 %v2051_v63, %v587_v50  ;;  %v803_v56 = vmax.f32 %v585_v42, 0.0 }
 0x11e   : > { %v806_v55 = vmax.f32 %v596_v44, 0.0 }
 0x11f   : > { %v804_v58 = vmax.f32 %v588_v51, 0.0 }
 0x120   : > { %v2085_v59 = vpack.c.bf16 %v806_v55, %v805_v52 }
 0x121   : > { %v2087_v60 = vpack.c.bf16 %v804_v58, %v803_v56  ;;  %v1444_v61 = vpop.f32.mrb[16].mxu0 }
 0x122   : > { %v609_v0 = vadd.f32 %v1444_v61, %v2051_v63  ;;  %v600_v1 = vpop.f32.mrb[17].mxu0 }
 0x123   : > { %v601_v6 = vadd.f32 %v2051_v63, %v600_v1  ;;  %v1445_v7 = vpop.f32.mrb[18].mxu0 }
 0x124   : > { %v612_v14 = vadd.f32 %v1445_v7, %v2051_v63  ;;  %v603_v15 = vpop.f32.mrb[19].mxu0  ;;  %v809_v21 = vmax.f32 %v609_v0, 0.0 }
 0x125   : > { %v604_v16 = vadd.f32 %v2051_v63, %v603_v15  ;;  %v807_v24 = vmax.f32 %v601_v6, 0.0 }
 0x126   : > { %v810_v22 = vmax.f32 %v612_v14, 0.0 }
 0x127   : > { %v808_v25 = vmax.f32 %v604_v16, 0.0 }
 0x128   : > { %v864_v27 = vpack.c.bf16 %v810_v22, %v809_v21 }
 0x129   : > { %v863_v32 = vpack.c.bf16 %v808_v25, %v807_v24  ;;  %v1448_v33 = vpop.f32.mrb[20].mxu0 }
 0x12a   : > { %v625_v12 = vadd.f32 %v1448_v33, %v2051_v63  ;;  %v616_v5 = vpop.f32.mrb[21].mxu0 }
 0x12b   : > { %v617_v30 = vadd.f32 %v2051_v63, %v616_v5  ;;  %v1449_v2 = vpop.f32.mrb[22].mxu0  ;;  %1357 = vmatprep.subr.bf16.mxu1 %v863_v32 }
 0x12c   : > { %v628_v46 = vadd.f32 %v1449_v2, %v2051_v63  ;;  %v619_v37 = vpop.f32.mrb[23].mxu0  ;;  %1358 = vmatpush3.bf16.msra.mxu1 %v2059_v31  ;;  %v813_v62 = vmax.f32 %v625_v12, 0.0 }
 0x12d   : > { %v620_v53 = vadd.f32 %v2051_v63, %v619_v37  ;;  %1359 = vmatprep.subr.bf16.mxu1 %v864_v27  ;;  %v811_v18 = vmax.f32 %v617_v30, 0.0 }
 0x12e   : > { %v814_v8 = vmax.f32 %v628_v46, 0.0 }
 0x12f   : > { %v812_v45 = vmax.f32 %v620_v53, 0.0 }
 0x130   : > { %v866_v11 = vpack.c.bf16 %v814_v8, %v813_v62  ;;  %1360 = vmatpush3.bf16.msra.mxu1 %v2057_v28 }
 0x131   : > { %v865_v3 = vpack.c.bf16 %v812_v45, %v811_v18  ;;  %v1452_v4 = vpop.f32.mrb[24].mxu0 }
 0x132   : > { %v641_v10 = vadd.f32 %v1452_v4, %v2051_v63  ;;  %v632_v19 = vpop.f32.mrb[25].mxu0 }
 0x133   : > { %v633_v20 = vadd.f32 %v2051_v63, %v632_v19  ;;  %v1453_v23 = vpop.f32.mrb[26].mxu0  ;;  %1361 = vmatprep.subr.bf16.mxu1 %v865_v3 }
 0x134   : > { %v644_v31 = vadd.f32 %v1453_v23, %v2051_v63  ;;  %v635_v26 = vpop.f32.mrb[27].mxu0  ;;  %1362 = vmatpush3.bf16.msra.mxu1 %v2070_v9  ;;  %v817_v29 = vmax.f32 %v641_v10, 0.0 }
 0x135   : > { %v636_v54 = vadd.f32 %v2051_v63, %v635_v26  ;;  %1363 = vmatprep.subr.bf16.mxu1 %v866_v11  ;;  %v815_v28 = vmax.f32 %v633_v20, 0.0 }
 0x136   : > { %v818_v13 = vmax.f32 %v644_v31, 0.0 }
 0x137   : > { %v816_v34 = vmax.f32 %v636_v54, 0.0 }
 0x138   : > { %v868_v35 = vpack.c.bf16 %v818_v13, %v817_v29  ;;  %1364 = vmatpush3.bf16.msra.mxu1 %v2066_v38 }
 0x139   : > { %v867_v39 = vpack.c.bf16 %v816_v34, %v815_v28  ;;  %v1456_v40 = vpop.f32.mrb[28].mxu0 }
 0x13a   : > { %v657_v48 = vadd.f32 %v1456_v40, %v2051_v63  ;;  %v648_v49 = vpop.f32.mrb[29].mxu0 }
 0x13b   : > { %v649_v36 = vadd.f32 %v2051_v63, %v648_v49  ;;  %v1457_v42 = vpop.f32.mrb[30].mxu0  ;;  %1365 = vmatprep.subr.bf16.mxu1 %v867_v39 }
 0x13c   : > { %v660_v9 = vadd.f32 %v1457_v42, %v2051_v63  ;;  %v651_v43 = vpop.f32.mrb[31].mxu0  ;;  %1366 = vmatpush3.bf16.msra.mxu1 %v2079_v47  ;;  %v821_v50 = vmax.f32 %v657_v48, 0.0 }
 0x13d   : > { %v652_v44 = vadd.f32 %v2051_v63, %v651_v43  ;;  %1367 = vmatprep.subr.bf16.mxu1 %v868_v35  ;;  %v819_v38 = vmax.f32 %v649_v36, 0.0 }
 0x13e   : > { %v822_v51 = vmax.f32 %v660_v9, 0.0 }
 0x13f   : > { %v820_v52 = vmax.f32 %v652_v44, 0.0 }
 0x140   : > { %v870_v55 = vpack.c.bf16 %v822_v51, %v821_v50  ;;  %1368 = vmatpush3.bf16.msra.mxu1 %v2077_v41 }
 0x141   : > { %v869_v56 = vpack.c.bf16 %v820_v52, %v819_v38  ;;  %v1460_v58 = vpop.f32.mrb[32].mxu0 }
 0x142   : > { %v673_v61 = vadd.f32 %v1460_v58, %v2051_v63  ;;  %v664_v0 = vpop.f32.mrb[33].mxu0 }
 0x143   : > { %v665_v1 = vadd.f32 %v2051_v63, %v664_v0  ;;  %v1461_v6 = vpop.f32.mrb[34].mxu0  ;;  %1369 = vmatprep.subr.bf16.mxu1 %v869_v56 }
 0x144   : > { %v676_v47 = vadd.f32 %v1461_v6, %v2051_v63  ;;  %v667_v7 = vpop.f32.mrb[35].mxu0  ;;  %1370 = vmatpush3.bf16.msra.mxu1 %v2087_v60  ;;  %v825_v41 = vmax.f32 %v673_v61, 0.0 }
 0x145   : > { %v668_v14 = vadd.f32 %v2051_v63, %v667_v7  ;;  %1371 = vmatprep.subr.bf16.mxu1 %v870_v55  ;;  %v823_v16 = vmax.f32 %v665_v1, 0.0 }
 0x146   : > { %v826_v15 = vmax.f32 %v676_v47, 0.0 }
 0x147   : > { %v824_v21 = vmax.f32 %v668_v14, 0.0 }
 0x148   : > { %v2118_v22 = vpack.c.bf16 %v826_v15, %v825_v41  ;;  %1372 = vmatpush3.bf16.msra.mxu1 %v2085_v59 }
 0x149   : > { %v2121_v24 = vpack.c.bf16 %v824_v21, %v823_v16  ;;  %v1464_v25 = vpop.f32.mrb[36].mxu0 }
 0x14a   : > { %v689_v60 = vadd.f32 %v1464_v25, %v2051_v63  ;;  %v680_v27 = vpop.f32.mrb[37].mxu0 }
 0x14b   : > { %v681_v32 = vadd.f32 %v2051_v63, %v680_v27  ;;  %v1465_v33 = vpop.f32.mrb[38].mxu0  ;;  %1290 = vmatmul.mubr.msk.bf16.vlgmr.msra.gmra.mrb[4].mxu1 %vm1288_vm5, %v2068_v57 }
 0x14c   : > { %v692_v12 = vadd.f32 %v1465_v33, %v2051_v63  ;;  %v683_v5 = vpop.f32.mrb[39].mxu0  ;;  %1293 = vmatprep.mubr.msk.bf16.mxu1 %vm1291_vm6, %v2068_v57  ;;  %v829_v30 = vmax.f32 %v689_v60, 0.0 }
 0x14d   : > { %v684_v59 = vadd.f32 %v2051_v63, %v683_v5  ;;  %v827_v46 = vmax.f32 %v681_v32, 0.0 }
 0x14e   : > { %v830_v2 = vmax.f32 %v692_v12, 0.0 }
 0x14f   : > { %v828_v37 = vmax.f32 %v684_v59, 0.0 }
 0x150   : > { %v2129_v53 = vpack.c.bf16 %v830_v2, %v829_v30 }
 0x151   : > { %v2131_v62 = vpack.c.bf16 %v828_v37, %v827_v46  ;;  %v1468_v8 = vpop.f32.mrb[40].mxu0 }
 0x152   : > { %v705_v18 = vadd.f32 %v1468_v8, %v2051_v63  ;;  %v696_v45 = vpop.f32.mrb[41].mxu0 }
 0x153   : > { %v697_v11 = vadd.f32 %v2051_v63, %v696_v45  ;;  %v1469_v3 = vpop.f32.mrb[42].mxu0 }
 0x154   : > { %v708_v4 = vadd.f32 %v1469_v3, %v2051_v63  ;;  %v699_v10 = vpop.f32.mrb[43].mxu0  ;;  %v833_v20 = vmax.f32 %v705_v18, 0.0 }
 0x155   : > { %v700_v19 = vadd.f32 %v2051_v63, %v699_v10  ;;  %v831_v31 = vmax.f32 %v697_v11, 0.0 }
 0x156   : > { %v834_v23 = vmax.f32 %v708_v4, 0.0 }
 0x157   : > { %v832_v26 = vmax.f32 %v700_v19, 0.0 }
 0x158   : > { %v2137_v54 = vpack.c.bf16 %v834_v23, %v833_v20 }
 0x159   : > { %v2139_v29 = vpack.c.bf16 %v832_v26, %v831_v31  ;;  %v1472_v13 = vpop.f32.mrb[44].mxu0 }
 0x15a   : > { %v721_v28 = vadd.f32 %v1472_v13, %v2051_v63  ;;  %v712_v34 = vpop.f32.mrb[45].mxu0 }
 0x15b   : > { %v713_v35 = vadd.f32 %v2051_v63, %v712_v34  ;;  %v1473_v39 = vpop.f32.mrb[46].mxu0 }
 0x15c   : > { %v724_v40 = vadd.f32 %v1473_v39, %v2051_v63  ;;  %v715_v48 = vpop.f32.mrb[47].mxu0  ;;  %v837_v36 = vmax.f32 %v721_v28, 0.0 }
 0x15d   : > { %v716_v49 = vadd.f32 %v2051_v63, %v715_v48  ;;  %v835_v9 = vmax.f32 %v713_v35, 0.0 }
 0x15e   : > { %v838_v42 = vmax.f32 %v724_v40, 0.0 }
 0x15f   : > { %v836_v43 = vmax.f32 %v716_v49, 0.0 }
 0x160   : > { %v2145_v44 = vpack.c.bf16 %v838_v42, %v837_v36 }
 0x161   : > { %v2147_v50 = vpack.c.bf16 %v836_v43, %v835_v9  ;;  %v1476_v51 = vpop.f32.mrb[48].mxu0  ;;  %v1560_v43 = vld [vmem:[%s2226_s6 + $0x20] sm:$0xff]  }
 0x162   : > { %v737_v38 = vadd.f32 %v1476_v51, %v2051_v63  ;;  %v728_v52 = vpop.f32.mrb[49].mxu0  ;;  %v1563_v51 = vld [vmem:[%s2226_s6 + $0x38] sm:$0xff]  }
 0x163   : > { %v729_v55 = vadd.f32 %v2051_v63, %v728_v52  ;;  %v1477_v56 = vpop.f32.mrb[50].mxu0 }
 0x164   : > { %v740_v58 = vadd.f32 %v1477_v56, %v2051_v63  ;;  %v731_v61 = vpop.f32.mrb[51].mxu0  ;;  %v841_v1 = vmax.f32 %v737_v38, 0.0 }
 0x165   : > { %v732_v0 = vadd.f32 %v2051_v63, %v731_v61  ;;  %v839_v47 = vmax.f32 %v729_v55, 0.0 }
 0x166   : > { %v842_v6 = vmax.f32 %v740_v58, 0.0 }
 0x167   : > { %v840_v7 = vmax.f32 %v732_v0, 0.0 }
 0x168   : > { %v880_v14 = vpack.c.bf16 %v842_v6, %v841_v1 }
 0x169   : > { %v879_v41 = vpack.c.bf16 %v840_v7, %v839_v47  ;;  %v1480_v15 = vpop.f32.mrb[52].mxu0 }
 0x16a   : > { %v753_v16 = vadd.f32 %v1480_v15, %v2051_v63  ;;  %v744_v21 = vpop.f32.mrb[53].mxu0 }
 0x16b   : > { %v745_v25 = vadd.f32 %v2051_v63, %v744_v21  ;;  %v1481_v60 = vpop.f32.mrb[54].mxu0  ;;  %1379 = vmatprep.subr.bf16.mxu1 %v879_v41  ;;  %v1297_v41 = vld [vmem:[%s2227_s7] ss:$0 sm:$0xff] }
 0x16c   : > { %v756_v27 = vadd.f32 %v1481_v60, %v2051_v63  ;;  %v747_v32 = vpop.f32.mrb[55].mxu0  ;;  %1380 = vmatpush3.bf16.msra.mxu1 %v2121_v24  ;;  %v845_v12 = vmax.f32 %v753_v16, 0.0 }
 0x16d   : > { %v748_v33 = vadd.f32 %v2051_v63, %v747_v32  ;;  %1381 = vmatprep.subr.bf16.mxu1 %v880_v14  ;;  %v843_v59 = vmax.f32 %v745_v25, 0.0 }
 0x16e   : > { %v846_v5 = vmax.f32 %v756_v27, 0.0 }
 0x16f   : > { %v844_v30 = vmax.f32 %v748_v33, 0.0 }
 0x170   : > { %v882_v2 = vpack.c.bf16 %v846_v5, %v845_v12  ;;  %1382 = vmatpush3.bf16.msra.mxu1 %v2118_v22 }
 0x171   : > { %v881_v46 = vpack.c.bf16 %v844_v30, %v843_v59  ;;  %v1484_v37 = vpop.f32.mrb[56].mxu0 }
 0x172   : > { %v769_v8 = vadd.f32 %v1484_v37, %v2051_v63  ;;  %v760_v18 = vpop.f32.mrb[57].mxu0 }
 0x173   : > { %v761_v45 = vadd.f32 %v2051_v63, %v760_v18  ;;  %v1485_v11 = vpop.f32.mrb[58].mxu0  ;;  %1383 = vmatprep.subr.bf16.mxu1 %v881_v46 }
 0x174   : > { %v772_v24 = vadd.f32 %v1485_v11, %v2051_v63  ;;  %v763_v3 = vpop.f32.mrb[59].mxu0  ;;  %1384 = vmatpush3.bf16.msra.mxu1 %v2131_v62  ;;  %v849_v10 = vmax.f32 %v769_v8, 0.0 }
 0x175   : > { %v764_v4 = vadd.f32 %v2051_v63, %v763_v3  ;;  %1385 = vmatprep.subr.bf16.mxu1 %v882_v2  ;;  %v847_v22 = vmax.f32 %v761_v45, 0.0 }
 0x176   : > { %v850_v19 = vmax.f32 %v772_v24, 0.0 }
 0x177   : > { %v848_v20 = vmax.f32 %v764_v4, 0.0 }
 0x178   : > { %v884_v23 = vpack.c.bf16 %v850_v19, %v849_v10  ;;  %1386 = vmatpush3.bf16.msra.mxu1 %v2129_v53 }
 0x179   : > { %v883_v31 = vpack.c.bf16 %v848_v20, %v847_v22  ;;  %v1488_v26 = vpop.f32.mrb[60].mxu0 }
 0x17a   : > { %v785_v13 = vadd.f32 %v1488_v26, %v2051_v63  ;;  %v776_v28 = vpop.f32.mrb[61].mxu0 }
 0x17b   : > { %v777_v34 = vadd.f32 %v2051_v63, %v776_v28  ;;  %v1489_v35 = vpop.f32.mrb[62].mxu0  ;;  %1387 = vmatprep.subr.bf16.mxu1 %v883_v31 }
 0x17c   : > { %v788_v62 = vadd.f32 %v1489_v35, %v2051_v63  ;;  %v779_v39 = vpop.f32.mrb[63].mxu0  ;;  %1388 = vmatpush3.bf16.msra.mxu1 %v2139_v29  ;;  %v853_v48 = vmax.f32 %v785_v13, 0.0  ;;  %v2257_v29 = vmov 0.0  }
 0x17d   : > { %v780_v40 = vadd.f32 %v2051_v63, %v779_v39  ;;  %1389 = vmatprep.subr.bf16.mxu1 %v884_v23  ;;  %v851_v53 = vmax.f32 %v777_v34, 0.0  ;;  %v1556_v63 = vld [vmem:[%s2226_s6] sm:$0xff]  }
 0x17e   : > { %v854_v49 = vmax.f32 %v788_v62, 0.0 }
 0x17f   : > { %v852_v36 = vmax.f32 %v780_v40, 0.0 }
 0x180   : > { %v886_v42 = vpack.c.bf16 %v854_v49, %v853_v48  ;;  %1390 = vmatpush3.bf16.msra.mxu1 %v2137_v54  ;;  %v1557_v54 = vld [vmem:[%s2226_s6 + $0x8] sm:$0xff]  }
 0x181   : > { %v885_v9 = vpack.c.bf16 %v852_v36, %v851_v53 }
 0x183   : > { %1391 = vmatprep.subr.bf16.mxu1 %v885_v9 }
 0x184   : > { %1392 = vmatpush3.bf16.msra.mxu1 %v2147_v50  ;;  %v1562_v50 = vld [vmem:[%s2226_s6 + $0x30] sm:$0xff]  }
 0x185   : > { %1393 = vmatprep.subr.bf16.mxu1 %v886_v42 }
 0x188   : > { %1394 = vmatpush3.bf16.msra.mxu1 %v2145_v44  ;;  %v1561_v44 = vld [vmem:[%s2226_s6 + $0x28] sm:$0xff]  }
 0x189   : > { %1510 = vmatprep.subr.bf16.mxu1 %v2257_v29 }
 0x18b   : > { %1296 = vmatmul.mubr.msk.bf16.vlgmr.msra.gmra.mrb[8].mxu1 %vm1294_vm8, %v2068_v57  ;;  %v1559_v57 = vld [vmem:[%s2226_s6 + $0x18] sm:$0xff]  }
 0x18c   : > { %1526 = vmatprep.mubr.msk.bf16.mxu1 %vm1573_vm0, %v2257_v29  ;;  %1511 = vmatpush3.bf16.msra.mxu1 %v1556_v63 }
 0x18d   : > { %1512 = vmatprep.subr.bf16.mxu1 %v2257_v29 }
 0x190   : > { %1513 = vmatpush3.bf16.msra.mxu1 %v1557_v54 }
 0x191   : > { %1514 = vmatprep.subr.bf16.mxu1 %v2257_v29 }
 0x194   : > { %1515 = vmatpush3.bf16.msra.mxu1 %v1558_v17 }
 0x195   : > { %1516 = vmatprep.subr.bf16.mxu1 %v2257_v29 }
 0x198   : > { %1517 = vmatpush3.bf16.msra.mxu1 %v1559_v57 }
 0x199   : > { %1518 = vmatprep.subr.bf16.mxu1 %v2257_v29 }
 0x19c   : > { %1519 = vmatpush3.bf16.msra.mxu1 %v1560_v43 }
 0x19d   : > { %1520 = vmatprep.subr.bf16.mxu1 %v2257_v29 }
 0x1a0   : > { %1521 = vmatpush3.bf16.msra.mxu1 %v1561_v44 }
 0x1a1   : > { %1522 = vmatprep.subr.bf16.mxu1 %v2257_v29 }
 0x1a4   : > { %1523 = vmatpush3.bf16.msra.mxu1 %v1562_v50 }
 0x1a5   : > { %1524 = vmatprep.subr.bf16.mxu1 %v2257_v29 }
 0x1a8   : > { %1525 = vmatpush3.bf16.msra.mxu1 %v1563_v51 }
 0x21e   : > { %v1373_v38 = vpop.f32.mrb[4].mxu1 }
 0x21f   : > { %v1374_v52 = vpop.f32.mrb[5].mxu1 }
 0x220   : > { %v1375_v55 = vadd.f32 %v1374_v52, %v1373_v38  ;;  %v1376_v56 = vpop.f32.mrb[6].mxu1 }
 0x221   : > { %v1377_v58 = vpop.f32.mrb[7].mxu1 }
 0x25e   : > { %v1395_v61 = vpop.f32.mrb[8].mxu1 }
 0x25f   : > { %v1396_v0 = vpop.f32.mrb[9].mxu1 }
 0x260   : > { %v1397_v1 = vadd.f32 %v1396_v0, %v1395_v61  ;;  %v1398_v6 = vpop.f32.mrb[10].mxu1 }
 0x261   : > { %v1399_v47 = vpop.f32.mrb[11].mxu1 }
 0x262   : > { %v1089_v7 = vadd.f32 %v1397_v1, %v1375_v55 }
 0x264   : > { %v1094_v14 = vpack.c.bf16 %v1089_v7, %v1089_v7 }
 0x266   : > { %1527 = vmatmul.mubr.bf16.vlgmr.msra.gmra.mrb[12].mxu1 %v1094_v14 }
 0x339   : > { %v1200_v15 = vpop.f32.mrb[12].mxu1 }
 0x33a   : > { %v1201_v16 = vadd.f32 %v1297_v41, %v1200_v15  ;;  %v1528_v21 = vpop.f32.mrb[13].mxu1 }
 0x33b   : > { %v1203_v25 = vpop.f32.mrb[14].mxu1 }
 0x33c   : > { %1206 = vst [vmem:[%s300_s23] sm:$0xf] %v1201_v16  ;;  %v1529_v60 = vpop.f32.mrb[15].mxu1 }
 0x33d PF: > { %s18_s27 = sadd.s32 1, %s1570_s27  }
 0x33e   : > { %p15_p4 = scmp.ge.s32.totalorder %s18_s27, 4  }
 0x340   :  { %17 = sbr.rel (!%p15_p4) target bundleno = 1 (0x1), region = 82 }

</bundles_post_ra>
